<compile_context>
chip_gen: v5e
topology: v5e:2x2
jax: 0.10.0
libtpu: 0.0.40
codegen_flags: <defaults>
</compile_context>

<pallas_src>
import math
import jax
import jax.numpy as jnp
from jax.experimental import pallas as pl
from jax.experimental.pallas import tpu as pltpu


def _round_up(x, m):
    return ((x + m - 1) // m) * m


def _mlp_kernel(*refs):
    """refs = (x_ref, w0, b0, w1, b1, ..., w_last, b_last, out_ref).

    Hidden layers apply ReLU; the final (output) layer does not.
    Matmuls run on the MXU with bf16 operands and f32 accumulation.
    """
    x_ref = refs[0]
    out_ref = refs[-1]
    param_refs = refs[1:-1]
    n_layers = len(param_refs) // 2

    h = x_ref[...]                                   # (tile_b, in) f32
    for i in range(n_layers):
        w = param_refs[2 * i][...]                   # (in, out), compute dtype (bf16)
        b = param_refs[2 * i + 1][...]               # (1, out), f32
        h = jnp.dot(h.astype(w.dtype), w, preferred_element_type=jnp.float32) + b
        if i < n_layers - 1:                         # ReLU on hidden layers only
            h = jnp.maximum(h, 0.0)
    out_ref[...] = h.astype(out_ref.dtype)


def _vmem_estimate_bytes(tile_b, in_dim, out_dim, params, compute_dtype):
    """Rough per-step VMEM footprint: resident params + double-buffered I/O tiles + activations."""
    cbytes = jnp.dtype(compute_dtype).itemsize
    weight_bytes = sum(w.size * cbytes + b.size * 4 for (w, b) in params)
    max_width = max([in_dim] + [w.shape[1] for (w, _) in params])
    act_bytes = tile_b * max_width * (4 + cbytes)                 # f32 act + compute-dtype operand
    io_bytes = 2 * (tile_b * in_dim * 4 + tile_b * out_dim * 4)   # double-buffered x / out tiles
    return weight_bytes + act_bytes + io_bytes


def state_classifier_forward(x, params, *, tile_b=128, compute_dtype=jnp.bfloat16):
    """x: (batch, in_features) f32.  params: list of (W(in,out) f32, b(1,out) f32) pairs."""
    batch, in_dim = x.shape
    out_dim = params[-1][0].shape[1]

    # Batch tile: multiple of 8 (sublane), capped at the requested tile size.
    tile_b = min(tile_b, _round_up(batch, 8))
    tile_b = _round_up(tile_b, 8)

    # Re-derive the tile if the VMEM budget would be blown (v7x has only 64 MiB / TC).
    vmem_cap = 48 * 1024 * 1024
    while tile_b > 8 and 2 * _vmem_estimate_bytes(tile_b, in_dim, out_dim, params, compute_dtype) > vmem_cap:
        tile_b = max(8, tile_b // 2)

    padded_batch = _round_up(batch, tile_b)
    if padded_batch != batch:
        x = jnp.pad(x, ((0, padded_batch - batch), (0, 0)))
    grid = (pl.cdiv(padded_batch, tile_b),)

    flat_params = []
    # x / out are tiled on the batch axis only; feature dims stay full-extent so the
    # (8,128)-or-full-dim BlockSpec rule holds for any layer width.
    in_specs = [pl.BlockSpec((tile_b, in_dim), lambda i: (i, 0))]
    for (w, b) in params:
        w_c = w.astype(compute_dtype)      # bf16 operands -> native MXU rate, half the VMEM
        b_c = b.astype(jnp.float32)        # keep bias / accumulation in f32
        flat_params.extend([w_c, b_c])
        # Constant index_map -> weights/biases are fetched once and stay VMEM-resident.
        in_specs.append(pl.BlockSpec(w_c.shape, lambda i: (0, 0)))
        in_specs.append(pl.BlockSpec(b_c.shape, lambda i: (0, 0)))

    out_spec = pl.BlockSpec((tile_b, out_dim), lambda i: (i, 0))

    est = _vmem_estimate_bytes(tile_b, in_dim, out_dim, params, compute_dtype)
    vmem_limit = int(min(vmem_cap, max(16 * 1024 * 1024, 2 * est)))

    out = pl.pallas_call(
        _mlp_kernel,
        out_shape=jax.ShapeDtypeStruct((padded_batch, out_dim), x.dtype),
        grid=grid,
        in_specs=in_specs,
        out_specs=out_spec,
        compiler_params=pltpu.CompilerParams(
            dimension_semantics=("parallel",),   # shard batch tiles across TCs on v7x
            vmem_limit_bytes=vmem_limit,
        ),
    )(x, *flat_params)

    return out[:batch]


def init_params(model_dict, key):
    """Deterministic Xavier-uniform weights, bias filled with 0.01 (matches init_weights)."""
    num_layers = model_dict['num_layers']
    layer_dims = [model_dict[str(i + 1)] for i in range(num_layers)]
    layer_dims.append(model_dict['output'])

    params = []
    for (fan_in, fan_out) in layer_dims:
        key, sub = jax.random.split(key)
        bound = math.sqrt(6.0 / (fan_in + fan_out))
        w = jax.random.uniform(sub, (fan_in, fan_out), jnp.float32, -bound, bound)
        b = jnp.full((1, fan_out), 0.01, jnp.float32)
        params.append((w, b))
    return params


def reference_forward(x, params, compute_dtype=jnp.float32):
    """Pure-JAX reference of the same forward pass (optionally with bf16 operand rounding)."""
    h = x
    n = len(params)
    for i, (w, b) in enumerate(params):
        h = jnp.dot(h.astype(compute_dtype), w.astype(compute_dtype),
                    preferred_element_type=jnp.float32) + b.astype(jnp.float32)
        if i < n - 1:
            h = jnp.maximum(h, 0.0)
    return h.astype(x.dtype)


if __name__ == "__main__":
    # Model consistent with StateClassifier's dict-driven construction:
    # two hidden Linear+ReLU layers, then an output Linear (no activation).
    # Hidden dims are 128-aligned so matmuls are MXU/lane friendly.
    model_dict = {
        'num_layers': 2,
        '1': (64, 128),
        '2': (128, 128),
        'output': (128, 4),
    }

    key = jax.random.PRNGKey(0)
    key, xkey = jax.random.split(key)

    batch = 256                      # 2 grid steps at tile_b=128 -> exercises the pipeline
    x = jax.random.normal(xkey, (batch, model_dict['1'][0]), jnp.float32)

    params = init_params(model_dict, key)

    out = state_classifier_forward(x, params)
    out = jax.block_until_ready(out)
    assert out.shape == (batch, model_dict['output'][1])

    # Tight check vs a reference that applies the same bf16 operand rounding.
    ref_bf16 = reference_forward(x, params, compute_dtype=jnp.bfloat16)
    assert jnp.allclose(out, ref_bf16, atol=1e-2, rtol=1e-2), "mismatch vs bf16-matched reference"

    # Looser check vs the full-f32 reference (only bf16 operand rounding differs).
    ref_f32 = reference_forward(x, params, compute_dtype=jnp.float32)
    assert jnp.allclose(out, ref_f32, atol=1e-1, rtol=5e-2), "mismatch vs f32 reference"

    print("KERNEL_OK")
</pallas_src>

<mosaic_0001>
module attributes {stable_mosaic.version = 11 : i64} {
  func.func @_mlp_kernel(%arg0: i32, %arg1: memref<128x64xf32, #tpu.memory_space<vmem>>, %arg2: memref<64x128xbf16, #tpu.memory_space<vmem>>, %arg3: memref<1x128xf32, #tpu.memory_space<vmem>>, %arg4: memref<128x128xbf16, #tpu.memory_space<vmem>>, %arg5: memref<1x128xf32, #tpu.memory_space<vmem>>, %arg6: memref<128x4xbf16, #tpu.memory_space<vmem>>, %arg7: memref<1x4xf32, #tpu.memory_space<vmem>>, %arg8: memref<128x4xf32, #tpu.memory_space<vmem>>) attributes {dimension_semantics = [#tpu.dimension_semantics<parallel>], iteration_bounds = array<i64: 2>, scalar_prefetch = 0 : i64, scratch_operands = 0 : i64, tpu.core_type = #tpu.core_type<tc>, window_params = [{transform_indices = @transform_0, window_bounds = array<i64: 128, 64>}, {pipeline_mode = #tpu.pipeline_mode<synchronous>, transform_indices = @transform_1, window_bounds = array<i64: 64, 128>}, {pipeline_mode = #tpu.pipeline_mode<synchronous>, transform_indices = @transform_2, window_bounds = array<i64: 1, 128>}, {pipeline_mode = #tpu.pipeline_mode<synchronous>, transform_indices = @transform_3, window_bounds = array<i64: 128, 128>}, {pipeline_mode = #tpu.pipeline_mode<synchronous>, transform_indices = @transform_4, window_bounds = array<i64: 1, 128>}, {pipeline_mode = #tpu.pipeline_mode<synchronous>, transform_indices = @transform_5, window_bounds = array<i64: 128, 4>}, {pipeline_mode = #tpu.pipeline_mode<synchronous>, transform_indices = @transform_6, window_bounds = array<i64: 1, 4>}, {transform_indices = @transform_7, window_bounds = array<i64: 128, 4>}]} {
    %c0 = arith.constant 0 : index
    %c0_0 = arith.constant 0 : index
    %0 = vector.load %arg1[%c0, %c0_0] : memref<128x64xf32, #tpu.memory_space<vmem>>, vector<128x64xf32>
    %c0_1 = arith.constant 0 : index
    %c0_2 = arith.constant 0 : index
    %1 = vector.load %arg2[%c0_1, %c0_2] : memref<64x128xbf16, #tpu.memory_space<vmem>>, vector<64x128xbf16>
    %c0_3 = arith.constant 0 : index
    %c0_4 = arith.constant 0 : index
    %2 = vector.load %arg3[%c0_3, %c0_4] : memref<1x128xf32, #tpu.memory_space<vmem>>, vector<1x128xf32>
    %3 = arith.truncf %0 : vector<128x64xf32> to vector<128x64xbf16>
    %cst = arith.constant dense<0.000000e+00> : vector<128x128xf32>
    %4 = tpu.matmul %3, %1, %cst {dimension_numbers = #tpu.dot_dimension_numbers<[1], [0], [0], [1], [0, 0, 1, 1], [], []>} : vector<128x64xbf16>, vector<64x128xbf16>, vector<128x128xf32> -> vector<128x128xf32>
    %5 = vector.broadcast %2 : vector<1x128xf32> to vector<128x128xf32>
    %6 = arith.addf %4, %5 : vector<128x128xf32>
    %cst_5 = arith.constant 0.000000e+00 : f32
    %7 = vector.broadcast %cst_5 : f32 to vector<128x128xf32>
    %8 = arith.maximumf %6, %7 : vector<128x128xf32>
    %c0_6 = arith.constant 0 : index
    %c0_7 = arith.constant 0 : index
    %9 = vector.load %arg4[%c0_6, %c0_7] : memref<128x128xbf16, #tpu.memory_space<vmem>>, vector<128x128xbf16>
    %c0_8 = arith.constant 0 : index
    %c0_9 = arith.constant 0 : index
    %10 = vector.load %arg5[%c0_8, %c0_9] : memref<1x128xf32, #tpu.memory_space<vmem>>, vector<1x128xf32>
    %11 = arith.truncf %8 : vector<128x128xf32> to vector<128x128xbf16>
    %cst_10 = arith.constant dense<0.000000e+00> : vector<128x128xf32>
    %12 = tpu.matmul %11, %9, %cst_10 {dimension_numbers = #tpu.dot_dimension_numbers<[1], [0], [0], [1], [0, 0, 1, 1], [], []>} : vector<128x128xbf16>, vector<128x128xbf16>, vector<128x128xf32> -> vector<128x128xf32>
    %13 = vector.broadcast %10 : vector<1x128xf32> to vector<128x128xf32>
    %14 = arith.addf %12, %13 : vector<128x128xf32>
    %cst_11 = arith.constant 0.000000e+00 : f32
    %15 = vector.broadcast %cst_11 : f32 to vector<128x128xf32>
    %16 = arith.maximumf %14, %15 : vector<128x128xf32>
    %c0_12 = arith.constant 0 : index
    %c0_13 = arith.constant 0 : index
    %17 = vector.load %arg6[%c0_12, %c0_13] : memref<128x4xbf16, #tpu.memory_space<vmem>>, vector<128x4xbf16>
    %c0_14 = arith.constant 0 : index
    %c0_15 = arith.constant 0 : index
    %18 = vector.load %arg7[%c0_14, %c0_15] : memref<1x4xf32, #tpu.memory_space<vmem>>, vector<1x4xf32>
    %19 = arith.truncf %16 : vector<128x128xf32> to vector<128x128xbf16>
    %cst_16 = arith.constant dense<0.000000e+00> : vector<128x4xf32>
    %20 = tpu.matmul %19, %17, %cst_16 {dimension_numbers = #tpu.dot_dimension_numbers<[1], [0], [0], [1], [0, 0, 1, 1], [], []>} : vector<128x128xbf16>, vector<128x4xbf16>, vector<128x4xf32> -> vector<128x4xf32>
    %21 = vector.broadcast %18 : vector<1x4xf32> to vector<128x4xf32>
    %22 = arith.addf %20, %21 : vector<128x4xf32>
    %c0_17 = arith.constant 0 : index
    %c0_18 = arith.constant 0 : index
    %23 = vector.load %arg8[%c0_17, %c0_18] : memref<128x4xf32, #tpu.memory_space<vmem>>, vector<128x4xf32>
    tpu.vector_store %arg8[%c0_17, %c0_18], %22 {strides = array<i32>} : memref<128x4xf32, #tpu.memory_space<vmem>>, vector<128x4xf32>,
    return
  }
  func.func @transform_0(%arg0: i32) -> (i32, i32) {
    %c0_i32 = arith.constant 0 : i32
    %c0_i32_0 = arith.constant 0 : i32
    return %arg0, %c0_i32 : i32, i32
  }
  func.func @transform_1(%arg0: i32) -> (i32, i32) {
    %c0_i32 = arith.constant 0 : i32
    %c0_i32_0 = arith.constant 0 : i32
    %c0_i32_1 = arith.constant 0 : i32
    return %c0_i32, %c0_i32_0 : i32, i32
  }
  func.func @transform_2(%arg0: i32) -> (i32, i32) {
    %c0_i32 = arith.constant 0 : i32
    %c0_i32_0 = arith.constant 0 : i32
    %c0_i32_1 = arith.constant 0 : i32
    return %c0_i32, %c0_i32_0 : i32, i32
  }
  func.func @transform_3(%arg0: i32) -> (i32, i32) {
    %c0_i32 = arith.constant 0 : i32
    %c0_i32_0 = arith.constant 0 : i32
    %c0_i32_1 = arith.constant 0 : i32
    return %c0_i32, %c0_i32_0 : i32, i32
  }
  func.func @transform_4(%arg0: i32) -> (i32, i32) {
    %c0_i32 = arith.constant 0 : i32
    %c0_i32_0 = arith.constant 0 : i32
    %c0_i32_1 = arith.constant 0 : i32
    return %c0_i32, %c0_i32_0 : i32, i32
  }
  func.func @transform_5(%arg0: i32) -> (i32, i32) {
    %c0_i32 = arith.constant 0 : i32
    %c0_i32_0 = arith.constant 0 : i32
    %c0_i32_1 = arith.constant 0 : i32
    return %c0_i32, %c0_i32_0 : i32, i32
  }
  func.func @transform_6(%arg0: i32) -> (i32, i32) {
    %c0_i32 = arith.constant 0 : i32
    %c0_i32_0 = arith.constant 0 : i32
    %c0_i32_1 = arith.constant 0 : i32
    return %c0_i32, %c0_i32_0 : i32, i32
  }
  func.func @transform_7(%arg0: i32) -> (i32, i32) {
    %c0_i32 = arith.constant 0 : i32
    %c0_i32_0 = arith.constant 0 : i32
    return %arg0, %c0_i32 : i32, i32
  }
}

</mosaic_0001>

<bundles_post_ra>
// kernel: tpu_custom_call.1
= control target key start
LH: loop header
LB: loop body
LE: loop exit
PB: predicated region body
PF: predicated region fallthrough
CT: control target
= control target key end

     0   :  { %s966_s24 = smov 0   ;;  %s1137_s0 = inlined_call_operand.vmem [shape: f32[256,64], index: 0, kind: input, shape index: {}]   ;;  %s1138_s1 = inlined_call_operand.vmem [shape: bf16[64,128], index: 1, kind: input, shape index: {}]   ;;  %s1139_s2 = inlined_call_operand.vmem [shape: f32[1,128], index: 2, kind: input, shape index: {}]   ;;  %s1140_s3 = inlined_call_operand.vmem [shape: bf16[128,128], index: 3, kind: input, shape index: {}]   ;;  %s1141_s4 = inlined_call_operand.vmem [shape: f32[1,128], index: 4, kind: input, shape index: {}]   ;;  %s1142_s5 = inlined_call_operand.vmem [shape: bf16[128,4], index: 5, kind: input, shape index: {}]   ;;  %s1143_s6 = inlined_call_operand.vmem [shape: f32[1,4], index: 6, kind: input, shape index: {}]   ;;  %s1144_s7 = inlined_call_operand.vmem [shape: f32[256,4], index: 7, kind: output, shape index: {}]  }
   0x1 LB: > { %s772_s25 = sadd.s32 4294967295, %s924_s24   ;;  %p776_p0 = scmp.ge.s32.totalorder %s924_s24, 1  ;;  %s924_s24 = sphi %s966_s24, %s17_s24  }
   0x2   : > { %p238_p1 = scmp.lt.s32.totalorder %s924_s24, 3 }
   0x4   : > { %p239_p2 = pnand %p776_p0, %p238_p1 }
   0x5   : > { %s777_s28 = sshll.u32 (!%p239_p2), %s772_s25, 4 }
   0x6   : > { %242 = sbr.rel (%p239_p2) target bundleno = 568 (0x238), region = 48  ;;  %p271_p3 = scmp.lt.s32.totalorder (!%p239_p2), %s777_s28, 31 }
   0xb   : > { %v874_v0 = vld [vmem:[%s1138_s1 + $0x18] sm:$0xff]  ;;  %v873_v1 = vld [vmem:[%s1138_s1 + $0x10] sm:$0xff]  ;;  %s1146_s28 = smov (!%p271_p3, %s777_s28), 31  ;;  %v872_v2 = vld [vmem:[%s1138_s1 + $0x8] sm:$0xff]  ;;  %vm343_vm0 = vcmask 523264   ;;  %vm699_vm1 = vcmask 31744  }
   0xc   : > { %372 = vmatpush.bf16.msra.mxu0 %v874_v0  ;;  %s778_s8 = sshll.u32 %s1146_s28, 3  ;;  %v871_v3 = vld [vmem:[%s1138_s1] sm:$0xff]  ;;  %v882_v19 = vld [vmem:[%s1140_s3 + $0x38] sm:$0xff]  ;;  %v881_v23 = vld [vmem:[%s1140_s3 + $0x30] sm:$0xff] }
   0xd   : > { %s991_s13 = scalar_lea.vmem %s1137_s0, %s778_s8  ;;  %509 = vmatpush.bf16.msra.mxu1 %v882_v19  ;;  %891 = vmatpush.bf16.msra.mxu3 %v882_v19  ;;  %v880_v24 = vld [vmem:[%s1140_s3 + $0x28] sm:$0xff]  ;;  %v879_v25 = vld [vmem:[%s1140_s3 + $0x20] sm:$0xff]  ;;  %v878_v28 = vld [vmem:[%s1140_s3 + $0x18] sm:$0xff]  ;;  %s1100_s16 = scalar_lea.vmem %s1144_s7, %s778_s8 }
   0xe   : > { %v283_v4 = vld [vmem:[%s991_s13] sm:$0xff]  ;;  %v284_v5 = vld [vmem:[%s991_s13 + $0x8] sm:$0xff]  ;;  %v285_v7 = vld [vmem:[%s991_s13 + $0x10] sm:$0xff] }
   0xf   : > { %v308_v6 = vpack.c.bf16 %v284_v5, %v283_v4  ;;  %v286_v8 = vld [vmem:[%s991_s13 + $0x18] sm:$0xff]  ;;  %v287_v10 = vld [vmem:[%s991_s13 + $0x20] sm:$0xff]  ;;  %v288_v11 = vld [vmem:[%s991_s13 + $0x28] sm:$0xff] }
  0x10   : > { %373 = vmatpush.bf16.msra.mxu0 %v873_v1  ;;  %v309_v9 = vpack.c.bf16 %v286_v8, %v285_v7  ;;  %v310_v12 = vpack.c.bf16 %v288_v11, %v287_v10  ;;  %v289_v13 = vld [vmem:[%s991_s13 + $0x30] sm:$0xff]  ;;  %v290_v14 = vld [vmem:[%s991_s13 + $0x38] sm:$0xff]  ;;  %v291_v16 = vld [vmem:[%s991_s13 + $0x40] sm:$0xff] }
  0x11   : > { %v311_v15 = vpack.c.bf16 %v290_v14, %v289_v13  ;;  %v292_v17 = vld [vmem:[%s991_s13 + $0x48] sm:$0xff]  ;;  %v293_v20 = vld [vmem:[%s991_s13 + $0x50] sm:$0xff]  ;;  %v294_v21 = vld [vmem:[%s991_s13 + $0x58] sm:$0xff]  ;;  %510 = vmatpush.bf16.msra.mxu1 %v881_v23  ;;  %892 = vmatpush.bf16.msra.mxu3 %v881_v23 }
  0x12   : > { %v312_v18 = vpack.c.bf16 %v292_v17, %v291_v16  ;;  %v313_v22 = vpack.c.bf16 %v294_v21, %v293_v20  ;;  %v295_v26 = vld [vmem:[%s991_s13 + $0x60] sm:$0xff]  ;;  %v296_v27 = vld [vmem:[%s991_s13 + $0x68] sm:$0xff]  ;;  %v877_v30 = vld [vmem:[%s1140_s3 + $0x10] sm:$0xff] }
  0x13   : > { %v314_v29 = vpack.c.bf16 %v296_v27, %v295_v26  ;;  %v876_v31 = vld [vmem:[%s1140_s3 + $0x8] sm:$0xff]  ;;  %v875_v32 = vld [vmem:[%s1140_s3] sm:$0xff]  ;;  %v297_v33 = vld [vmem:[%s991_s13 + $0x70] sm:$0xff] }
  0x14   : > { %374 = vmatpush.bf16.msra.mxu0 %v872_v2  ;;  %v298_v34 = vld [vmem:[%s991_s13 + $0x78] sm:$0xff]  ;;  %v1047_v37 = vld [vmem:[%s1139_s2] ss:$0 sm:$0xff]  ;;  %v889_v16 = vld [vmem:[%s1142_s5 + $0x30] sm:$0xff] }
  0x15   : > { %511 = vmatpush.bf16.msra.mxu1 %v880_v24  ;;  %893 = vmatpush.bf16.msra.mxu3 %v880_v24  ;;  %v315_v35 = vpack.c.bf16 %v298_v34, %v297_v33  ;;  %v887_v19 = vld [vmem:[%s1142_s5 + $0x20] sm:$0xff]  ;;  %v886_v23 = vld [vmem:[%s1142_s5 + $0x18] sm:$0xff]  ;;  %v885_v27 = vld [vmem:[%s1142_s5 + $0x10] sm:$0xff] }
  0x18   : > { %375 = vmatpush.bf16.msra.mxu0 %v871_v3 }
  0x19   : > { %512 = vmatpush.bf16.msra.mxu1 %v879_v25  ;;  %894 = vmatpush.bf16.msra.mxu3 %v879_v25 }
  0x1b   : > { %797 = vmatmul.msk.bf16.vlgmr.msra.gmra.mxu0 %vm343_vm0, %v308_v6 }
  0x1d   : > { %513 = vmatpush.bf16.msra.mxu1 %v878_v28  ;;  %895 = vmatpush.bf16.msra.mxu3 %v878_v28 }
  0x21   : > { %514 = vmatpush.bf16.msra.mxu1 %v877_v30  ;;  %896 = vmatpush.bf16.msra.mxu3 %v877_v30  ;;  %v883_v30 = vld [vmem:[%s1142_s5] sm:$0xff] }
  0x25   : > { %515 = vmatpush.bf16.msra.mxu1 %v876_v31  ;;  %897 = vmatpush.bf16.msra.mxu3 %v876_v31 }
  0x29   : > { %516 = vmatpush.bf16.msra.mxu1 %v875_v32  ;;  %898 = vmatpush.bf16.msra.mxu3 %v875_v32 }
  0x2b   : > { %798 = vmatmul.msk.bf16.gmra.mxu0 %vm343_vm0, %v309_v9 }
  0x3b   : > { %799 = vmatmul.msk.bf16.gmra.mxu0 %vm343_vm0, %v310_v12  ;;  %v890_v12 = vld [vmem:[%s1142_s5 + $0x38] sm:$0xff] }
  0x3c   : > { %650 = vmatpush.bf16.msra.mxu2 %v890_v12  ;;  %899 = vmatpush.bf16.msrb.mxu3 %v890_v12 }
  0x40   : > { %651 = vmatpush.bf16.msra.mxu2 %v889_v16  ;;  %900 = vmatpush.bf16.msrb.mxu3 %v889_v16 }
  0x4b   : > { %800 = vmatmul.msk.bf16.gmra.mxu0 %vm343_vm0, %v311_v15 }
  0x5b   : > { %801 = vmatmul.msk.bf16.gmra.mxu0 %vm343_vm0, %v312_v18  ;;  %v888_v18 = vld [vmem:[%s1142_s5 + $0x28] sm:$0xff] }
  0x5c   : > { %652 = vmatpush.bf16.msra.mxu2 %v888_v18  ;;  %901 = vmatpush.bf16.msrb.mxu3 %v888_v18 }
  0x60   : > { %653 = vmatpush.bf16.msra.mxu2 %v887_v19  ;;  %902 = vmatpush.bf16.msrb.mxu3 %v887_v19 }
  0x64   : > { %654 = vmatpush.bf16.msra.mxu2 %v886_v23  ;;  %903 = vmatpush.bf16.msrb.mxu3 %v886_v23 }
  0x68   : > { %655 = vmatpush.bf16.msra.mxu2 %v885_v27  ;;  %904 = vmatpush.bf16.msrb.mxu3 %v885_v27 }
  0x6b   : > { %802 = vmatmul.msk.bf16.gmra.mxu0 %vm343_vm0, %v313_v22 }
  0x7b   : > { %803 = vmatmul.msk.bf16.gmra.mxu0 %vm343_vm0, %v314_v29  ;;  %v884_v29 = vld [vmem:[%s1142_s5 + $0x8] sm:$0xff] }
  0x7c   : > { %656 = vmatpush.bf16.msra.mxu2 %v884_v29  ;;  %905 = vmatpush.bf16.msrb.mxu3 %v884_v29 }
  0x80   : > { %657 = vmatpush.bf16.msra.mxu2 %v883_v30  ;;  %906 = vmatpush.bf16.msrb.mxu3 %v883_v30  ;;  %v917_v30 = vld [vmem:[%s1143_s6] ss:$0 sm:$0xff] }
  0x8b   : > { %804 = vmatmul.msk.bf16.gmra.mxu0 %vm343_vm0, %v315_v35 }
  0x98   : > { %v377_v36 = vpop.f32.mrf.mxu0 }
  0x99   : > { %v378_v38 = vadd.f32 %v1047_v37, %v377_v36 }
  0x9b   : > { %v417_v41 = vmax.f32 %v378_v38, 0.0 }
  0xa0   : > { %v379_v39 = vpop.f32.mrf.mxu0 }
  0xa1   : > { %v380_v40 = vadd.f32 %v1047_v37, %v379_v39  ;;  %v916_v39 = vld [vmem:[%s1141_s4] ss:$0 sm:$0xff] }
  0xa3   : > { %v418_v42 = vmax.f32 %v380_v40, 0.0 }
  0xa5   : > { %v450_v43 = vpack.c.bf16 %v418_v42, %v417_v41 }
  0xa7   : > { %517 = vmatmul.bf16.vlgmr.msra.gmra.mxu1 %v450_v43 }
  0xa8   : > { %v382_v44 = vpop.f32.mrf.mxu0 }
  0xa9   : > { %v383_v45 = vadd.f32 %v1047_v37, %v382_v44 }
  0xab   : > { %v419_v48 = vmax.f32 %v383_v45, 0.0 }
  0xb0   : > { %v384_v46 = vpop.f32.mrf.mxu0 }
  0xb1   : > { %v385_v47 = vadd.f32 %v1047_v37, %v384_v46 }
  0xb3   : > { %v420_v49 = vmax.f32 %v385_v47, 0.0 }
  0xb5   : > { %v451_v50 = vpack.c.bf16 %v420_v49, %v419_v48 }
  0xb7   : > { %522 = vmatmul.bf16.gmra.mxu1 %v451_v50 }
  0xb8   : > { %v387_v51 = vpop.f32.mrf.mxu0 }
  0xb9   : > { %v388_v52 = vadd.f32 %v1047_v37, %v387_v51 }
  0xbb   : > { %v421_v55 = vmax.f32 %v388_v52, 0.0 }
  0xc0   : > { %v389_v53 = vpop.f32.mrf.mxu0 }
  0xc1   : > { %v390_v54 = vadd.f32 %v1047_v37, %v389_v53 }
  0xc3   : > { %v422_v56 = vmax.f32 %v390_v54, 0.0 }
  0xc5   : > { %v452_v57 = vpack.c.bf16 %v422_v56, %v421_v55 }
  0xc7   : > { %527 = vmatmul.bf16.gmra.mxu1 %v452_v57 }
  0xc8   : > { %v392_v58 = vpop.f32.mrf.mxu0 }
  0xc9   : > { %v393_v59 = vadd.f32 %v1047_v37, %v392_v58 }
  0xcb   : > { %v423_v62 = vmax.f32 %v393_v59, 0.0 }
  0xd0   : > { %v394_v60 = vpop.f32.mrf.mxu0 }
  0xd1   : > { %v395_v61 = vadd.f32 %v1047_v37, %v394_v60 }
  0xd3   : > { %v424_v63 = vmax.f32 %v395_v61, 0.0 }
  0xd5   : > { %v453_v0 = vpack.c.bf16 %v424_v63, %v423_v62 }
  0xd7   : > { %532 = vmatmul.bf16.gmra.mxu1 %v453_v0 }
  0xd8   : > { %v397_v1 = vpop.f32.mrf.mxu0 }
  0xd9   : > { %v398_v2 = vadd.f32 %v1047_v37, %v397_v1 }
  0xdb   : > { %v425_v5 = vmax.f32 %v398_v2, 0.0 }
  0xe0   : > { %v399_v3 = vpop.f32.mrf.mxu0 }
  0xe1   : > { %v400_v4 = vadd.f32 %v1047_v37, %v399_v3 }
  0xe3   : > { %v426_v6 = vmax.f32 %v400_v4, 0.0 }
  0xe5   : > { %v454_v7 = vpack.c.bf16 %v426_v6, %v425_v5 }
  0xe7   : > { %537 = vmatmul.bf16.gmra.mxu1 %v454_v7 }
  0xe8   : > { %v402_v8 = vpop.f32.mrf.mxu0 }
  0xe9   : > { %v403_v9 = vadd.f32 %v1047_v37, %v402_v8 }
  0xeb   : > { %v427_v13 = vmax.f32 %v403_v9, 0.0 }
  0xf0   : > { %v404_v10 = vpop.f32.mrf.mxu0 }
  0xf1   : > { %v405_v11 = vadd.f32 %v1047_v37, %v404_v10 }
  0xf3   : > { %v428_v14 = vmax.f32 %v405_v11, 0.0 }
  0xf5   : > { %v455_v15 = vpack.c.bf16 %v428_v14, %v427_v13 }
  0xf7   : > { %542 = vmatmul.bf16.gmra.mxu1 %v455_v15 }
  0xf8   : > { %v407_v17 = vpop.f32.mrf.mxu0 }
  0xf9   : > { %v408_v20 = vadd.f32 %v1047_v37, %v407_v17 }
  0xfb   : > { %v429_v24 = vmax.f32 %v408_v20, 0.0 }
 0x100   : > { %v409_v21 = vpop.f32.mrf.mxu0 }
 0x101   : > { %v410_v22 = vadd.f32 %v1047_v37, %v409_v21 }
 0x103   : > { %v430_v25 = vmax.f32 %v410_v22, 0.0 }
 0x105   : > { %v456_v26 = vpack.c.bf16 %v430_v25, %v429_v24 }
 0x107   : > { %547 = vmatmul.bf16.vlgmr.msra.gmra.mxu3 %v456_v26 }
 0x108   : > { %v412_v28 = vpop.f32.mrf.mxu0 }
 0x109   : > { %v413_v31 = vadd.f32 %v1047_v37, %v412_v28 }
 0x10b   : > { %v431_v34 = vmax.f32 %v413_v31, 0.0 }
 0x110   : > { %v414_v32 = vpop.f32.mrf.mxu0 }
 0x111   : > { %v415_v33 = vadd.f32 %v1047_v37, %v414_v32 }
 0x113   : > { %v432_v35 = vmax.f32 %v415_v33, 0.0 }
 0x115   : > { %v457_v36 = vpack.c.bf16 %v432_v35, %v431_v34 }
 0x117   : > { %552 = vmatmul.bf16.gmra.mxu3 %v457_v36 }
 0x124   : > { %v518_v38 = vpop.f32.mrf.mxu1 }
 0x125   : > { %v519_v40 = vadd.f32 %v916_v39, %v518_v38 }
 0x127   : > { %v558_v43 = vmax.f32 %v519_v40, 0.0 }
 0x12c   : > { %v520_v41 = vpop.f32.mrf.mxu1 }
 0x12d   : > { %v521_v42 = vadd.f32 %v916_v39, %v520_v41 }
 0x12f   : > { %v559_v44 = vmax.f32 %v521_v42, 0.0 }
 0x131   : > { %v591_v45 = vpack.c.bf16 %v559_v44, %v558_v43 }
 0x133   : > { %658 = vmatmul.bf16.vlgmr.msra.gmra.mxu2 %v591_v45 }
 0x134   : > { %v523_v46 = vpop.f32.mrf.mxu1 }
 0x135   : > { %v524_v47 = vadd.f32 %v916_v39, %v523_v46 }
 0x137   : > { %v560_v49 = vmax.f32 %v524_v47, 0.0 }
 0x13c   : > { %v525_v48 = vpop.f32.mrf.mxu1 }
 0x13d   : > { %v526_v37 = vadd.f32 %v916_v39, %v525_v48 }
 0x13f   : > { %v561_v50 = vmax.f32 %v526_v37, 0.0 }
 0x141   : > { %v592_v51 = vpack.c.bf16 %v561_v50, %v560_v49 }
 0x143   : > { %663 = vmatmul.bf16.gmra.mxu2 %v592_v51 }
 0x144   : > { %v528_v52 = vpop.f32.mrf.mxu1 }
 0x145   : > { %v529_v53 = vadd.f32 %v916_v39, %v528_v52 }
 0x147   : > { %v562_v56 = vmax.f32 %v529_v53, 0.0 }
 0x14c   : > { %v530_v54 = vpop.f32.mrf.mxu1 }
 0x14d   : > { %v531_v55 = vadd.f32 %v916_v39, %v530_v54 }
 0x14f   : > { %v563_v57 = vmax.f32 %v531_v55, 0.0 }
 0x151   : > { %v593_v58 = vpack.c.bf16 %v563_v57, %v562_v56 }
 0x153   : > { %668 = vmatmul.bf16.gmra.mxu2 %v593_v58 }
 0x154   : > { %v533_v59 = vpop.f32.mrf.mxu1 }
 0x155   : > { %v534_v60 = vadd.f32 %v916_v39, %v533_v59 }
 0x157   : > { %v564_v63 = vmax.f32 %v534_v60, 0.0 }
 0x15c   : > { %v535_v61 = vpop.f32.mrf.mxu1 }
 0x15d   : > { %v536_v62 = vadd.f32 %v916_v39, %v535_v61 }
 0x15f   : > { %v565_v0 = vmax.f32 %v536_v62, 0.0 }
 0x161   : > { %v594_v1 = vpack.c.bf16 %v565_v0, %v564_v63 }
 0x163   : > { %673 = vmatmul.bf16.gmra.mxu2 %v594_v1 }
 0x164   : > { %v538_v2 = vpop.f32.mrf.mxu1 }
 0x165   : > { %v539_v3 = vadd.f32 %v916_v39, %v538_v2 }
 0x167   : > { %v566_v6 = vmax.f32 %v539_v3, 0.0 }
 0x16c   : > { %v540_v4 = vpop.f32.mrf.mxu1 }
 0x16d   : > { %v541_v5 = vadd.f32 %v916_v39, %v540_v4 }
 0x16f   : > { %v567_v7 = vmax.f32 %v541_v5, 0.0 }
 0x171   : > { %v595_v8 = vpack.c.bf16 %v567_v7, %v566_v6 }
 0x173   : > { %678 = vmatmul.bf16.gmra.mxu2 %v595_v8 }
 0x174   : > { %v543_v9 = vpop.f32.mrf.mxu1 }
 0x175   : > { %v544_v10 = vadd.f32 %v916_v39, %v543_v9 }
 0x177   : > { %v568_v13 = vmax.f32 %v544_v10, 0.0 }
 0x17c   : > { %v545_v11 = vpop.f32.mrf.mxu1 }
 0x17d   : > { %v546_v12 = vadd.f32 %v916_v39, %v545_v11 }
 0x17f   : > { %v569_v14 = vmax.f32 %v546_v12, 0.0 }
 0x181   : > { %v596_v15 = vpack.c.bf16 %v569_v14, %v568_v13 }
 0x183   : > { %683 = vmatmul.bf16.gmra.mxu2 %v596_v15 }
 0x18a   : > { %v548_v16 = vpop.f32.mrf.mxu3 }
 0x18b   : > { %v549_v17 = vadd.f32 %v916_v39, %v548_v16 }
 0x18d   : > { %v570_v20 = vmax.f32 %v549_v17, 0.0 }
 0x192   : > { %v550_v18 = vpop.f32.mrf.mxu3 }
 0x193   : > { %v551_v19 = vadd.f32 %v916_v39, %v550_v18 }
 0x195   : > { %v571_v21 = vmax.f32 %v551_v19, 0.0 }
 0x197   : > { %v597_v22 = vpack.c.bf16 %v571_v21, %v570_v20 }
 0x199   : > { %688 = vmatmul.bf16.vlgmr.msrb.gmra.mxu3 %v597_v22 }
 0x19a   : > { %v553_v23 = vpop.f32.mrf.mxu3 }
 0x19b   : > { %v554_v24 = vadd.f32 %v916_v39, %v553_v23 }
 0x19d   : > { %v572_v27 = vmax.f32 %v554_v24, 0.0 }
 0x1a2   : > { %v555_v25 = vpop.f32.mrf.mxu3 }
 0x1a3   : > { %v556_v26 = vadd.f32 %v916_v39, %v555_v25 }
 0x1a5   : > { %v573_v28 = vmax.f32 %v556_v26, 0.0 }
 0x1a7   : > { %v598_v29 = vpack.c.bf16 %v573_v28, %v572_v27 }
 0x1a9   : > { %693 = vmatmul.bf16.gmra.mxu3 %v598_v29 }
 0x1b6   : > { %v659_v31 = vpop.f32.mrf.mxu2 }
 0x1b7   : > { %v660_v32 = vadd.f32 %v917_v30, %v659_v31 }
 0x1b9   : > { %700 = vst.msk [vmem:[%s1100_s16] sm:$0xff] %vm699_vm1, %v660_v32 }
 0x1be   : > { %v661_v33 = vpop.f32.mrf.mxu2 }
 0x1bf   : > { %v662_v34 = vadd.f32 %v917_v30, %v661_v33 }
 0x1c1   : > { %701 = vst.msk [vmem:[%s1100_s16 + $0x8] sm:$0xff] %vm699_vm1, %v662_v34 }
 0x1c6   : > { %v664_v35 = vpop.f32.mrf.mxu2 }
 0x1c7   : > { %v665_v36 = vadd.f32 %v917_v30, %v664_v35 }
 0x1c9   : > { %702 = vst.msk [vmem:[%s1100_s16 + $0x10] sm:$0xff] %vm699_vm1, %v665_v36 }
 0x1ce   : > { %v666_v38 = vpop.f32.mrf.mxu2 }
 0x1cf   : > { %v667_v39 = vadd.f32 %v917_v30, %v666_v38 }
 0x1d1   : > { %703 = vst.msk [vmem:[%s1100_s16 + $0x18] sm:$0xff] %vm699_vm1, %v667_v39 }
 0x1d6   : > { %v669_v40 = vpop.f32.mrf.mxu2 }
 0x1d7   : > { %v670_v41 = vadd.f32 %v917_v30, %v669_v40 }
 0x1d9   : > { %704 = vst.msk [vmem:[%s1100_s16 + $0x20] sm:$0xff] %vm699_vm1, %v670_v41 }
 0x1de   : > { %v671_v42 = vpop.f32.mrf.mxu2 }
 0x1df   : > { %v672_v43 = vadd.f32 %v917_v30, %v671_v42 }
 0x1e1   : > { %705 = vst.msk [vmem:[%s1100_s16 + $0x28] sm:$0xff] %vm699_vm1, %v672_v43 }
 0x1e6   : > { %v674_v44 = vpop.f32.mrf.mxu2 }
 0x1e7   : > { %v675_v45 = vadd.f32 %v917_v30, %v674_v44 }
 0x1e9   : > { %706 = vst.msk [vmem:[%s1100_s16 + $0x30] sm:$0xff] %vm699_vm1, %v675_v45 }
 0x1ee   : > { %v676_v46 = vpop.f32.mrf.mxu2 }
 0x1ef   : > { %v677_v47 = vadd.f32 %v917_v30, %v676_v46 }
 0x1f1   : > { %707 = vst.msk [vmem:[%s1100_s16 + $0x38] sm:$0xff] %vm699_vm1, %v677_v47 }
 0x1f6   : > { %v679_v48 = vpop.f32.mrf.mxu2 }
 0x1f7   : > { %v680_v37 = vadd.f32 %v917_v30, %v679_v48 }
 0x1f9   : > { %708 = vst.msk [vmem:[%s1100_s16 + $0x40] sm:$0xff] %vm699_vm1, %v680_v37 }
 0x1fe   : > { %v681_v49 = vpop.f32.mrf.mxu2 }
 0x1ff   : > { %v682_v50 = vadd.f32 %v917_v30, %v681_v49 }
 0x201   : > { %709 = vst.msk [vmem:[%s1100_s16 + $0x48] sm:$0xff] %vm699_vm1, %v682_v50 }
 0x206   : > { %v684_v51 = vpop.f32.mrf.mxu2 }
 0x207   : > { %v685_v52 = vadd.f32 %v917_v30, %v684_v51 }
 0x209   : > { %710 = vst.msk [vmem:[%s1100_s16 + $0x50] sm:$0xff] %vm699_vm1, %v685_v52 }
 0x20e   : > { %v686_v53 = vpop.f32.mrf.mxu2 }
 0x20f   : > { %v687_v54 = vadd.f32 %v917_v30, %v686_v53 }
 0x211   : > { %711 = vst.msk [vmem:[%s1100_s16 + $0x58] sm:$0xff] %vm699_vm1, %v687_v54 }
 0x21c   : > { %v689_v55 = vpop.f32.mrf.mxu3 }
 0x21d   : > { %v690_v56 = vadd.f32 %v917_v30, %v689_v55 }
 0x21f   : > { %712 = vst.msk [vmem:[%s1100_s16 + $0x60] sm:$0xff] %vm699_vm1, %v690_v56 }
 0x224   : > { %v691_v57 = vpop.f32.mrf.mxu3 }
 0x225   : > { %v692_v58 = vadd.f32 %v917_v30, %v691_v57 }
 0x227   : > { %713 = vst.msk [vmem:[%s1100_s16 + $0x68] sm:$0xff] %vm699_vm1, %v692_v58 }
 0x22c   : > { %v694_v59 = vpop.f32.mrf.mxu3 }
 0x22d   : > { %v695_v60 = vadd.f32 %v917_v30, %v694_v59 }
 0x22f   : > { %714 = vst.msk [vmem:[%s1100_s16 + $0x70] sm:$0xff] %vm699_vm1, %v695_v60 }
 0x234   : > { %v696_v61 = vpop.f32.mrf.mxu3 }
 0x235   : > { %v697_v62 = vadd.f32 %v917_v30, %v696_v61 }
 0x237   : > { %715 = vst.msk [vmem:[%s1100_s16 + $0x78] sm:$0xff] %vm699_vm1, %v697_v62 }
 0x238 PF: > { %s17_s24 = sadd.s32 1, %s924_s24  }
 0x239   : > { %p14_p4 = scmp.ge.s32.totalorder %s17_s24, 4  }
 0x23b   :  { %16 = sbr.rel (!%p14_p4) target bundleno = 1 (0x1), region = 78 }

</bundles_post_ra>
